<compile_context>
chip_gen: v5e
topology: v5e:2x2
jax: 0.10.0
libtpu: 0.0.40
codegen_flags: <defaults>
</compile_context>

<pallas_src>
import jax
import jax.numpy as jnp
from jax import lax
from jax.experimental import pallas as pl
from jax.experimental.pallas import tpu as pltpu


def _translation_kernel(m_ref, x_ref, o_ref):
    # m_ref: (d*d, d*d) = kron(W_f, W_f) for the current frequency bin; its
    #        block index depends only on the outer grid axis, so it is resident
    #        in VMEM across the inner batch-block loop.
    # x_ref: (TB, d*d) block of row-major-flattened X matrices for frequency f.
    # o_ref: (TB, d*d) corresponding output block.
    x = x_ref[...]
    m = m_ref[...]
    # out[b, r] = sum_c m[r, c] * x[b, c]  — contract x axis 1 with m axis 1 so
    # the "transpose" lives in the contraction, never materialized.
    o = lax.dot_general(
        x,
        m,
        dimension_numbers=(((1,), (1,)), ((), ())),
        preferred_element_type=jnp.float32,
    )
    o_ref[...] = o.astype(o_ref.dtype)


def translation_forward_pallas(W, X, *, block_rows=512):
    """W: (n_freq, d, d), X: (batch, n_freq, d, d) -> (batch, n_freq, d, d)."""
    n_freq, d, _ = W.shape
    batch = X.shape[0]
    assert X.shape == (batch, n_freq, d, d)
    dd = d * d

    # M[f] = W[f] (x) W[f]  (Kronecker product), so that for row-major
    # flattening: vec(W X W^T) = M @ vec(X).  Parameter-only preprocessing.
    M = (W[:, :, None, :, None] * W[:, None, :, None, :]).reshape(n_freq, dd, dd)
    M = M.astype(X.dtype)

    # Free reshape: each (b, f) matrix becomes one contiguous, lane-dense
    # 256-wide row slab.
    Xf = X.reshape(batch, n_freq * dd)

    if batch <= block_rows:
        tb = batch            # block equals full dim -> no (8,128) constraint
    else:
        tb = block_rows       # multiple of 8; final partial block padded/masked
    num_bb = pl.cdiv(batch, tb)

    grid = (n_freq, num_bb)   # frequency outer => M block stays resident

    m_spec = pl.BlockSpec((pl.Squeezed(), dd, dd), lambda f, bb: (f, 0, 0))
    x_spec = pl.BlockSpec((tb, dd), lambda f, bb: (bb, f))
    o_spec = pl.BlockSpec((tb, dd), lambda f, bb: (bb, f))

    out_flat = pl.pallas_call(
        _translation_kernel,
        out_shape=jax.ShapeDtypeStruct((batch, n_freq * dd), X.dtype),
        grid_spec=pltpu.PrefetchScalarGridSpec(
            num_scalar_prefetch=0,
            grid=grid,
            in_specs=[m_spec, x_spec],
            out_specs=o_spec,
        ),
        compiler_params=pltpu.CompilerParams(
            dimension_semantics=("parallel", "parallel"),
        ),
    )(M, Xf)
    return out_flat.reshape(batch, n_freq, d, d)


def translation_forward(W, X, *, block_rows=512, min_matrices_for_pallas=256):
    """Dispatcher: tiny problems go to the fused XLA path (pallas_call fixed
    overhead would dominate), realistic sizes go to the Pallas kernel."""
    batch, n_freq = X.shape[0], X.shape[1]
    if batch * n_freq < min_matrices_for_pallas:
        return jnp.matmul(W[None], jnp.matmul(X, jnp.swapaxes(W, -1, -2)[None]))
    return translation_forward_pallas(W, X, block_rows=block_rows)


def make_params(n_freq, d, dtype=jnp.float32):
    """Deterministic SPD parameter W of shape (n_freq, d, d).

    The torch module initializes W to the identity and projects it onto the
    SPD manifold (geoopt ManifoldParameter.proj_), which leaves the identity
    unchanged; identity would make the forward trivially X -> X, so we build a
    deterministic SPD W (A @ A^T + I per frequency) from PRNGKey(0) to exercise
    the kernel while keeping the exact forward-pass semantics.
    """
    # TODO(synk): geoopt's SPD-manifold projection/parameterization is training-
    # time parameter machinery with no forward-pass role; not translated.
    key = jax.random.PRNGKey(0)
    A = jax.random.normal(key, (n_freq, d, d), dtype=jnp.float32) * 0.1
    W = jnp.einsum("fij,fkj->fik", A, A) + jnp.eye(d, dtype=jnp.float32)[None]
    return W.astype(dtype)


if __name__ == "__main__":
    batch, n_freq, d = 64, 8, 16
    dtype = jnp.float32

    W = make_params(n_freq, d, dtype)

    key = jax.random.PRNGKey(0)
    # Deterministic SPD-ish inputs X (the module expects SPD matrices).
    B = jax.random.normal(
        jax.random.fold_in(key, 1), (batch, n_freq, d, d), dtype=jnp.float32
    )
    X = (
        jnp.einsum("bfij,bfkj->bfik", B, B)
        + jnp.eye(d, dtype=jnp.float32)[None, None]
    ).astype(dtype)

    # Run the Pallas kernel (these shapes are above the tiny-problem threshold,
    # so translation_forward would dispatch here too).
    out = translation_forward_pallas(W, X)
    out = jax.block_until_ready(out)

    # Reference (plain JAX, mirrors torch.matmul(W, torch.matmul(X, W.transpose(2,1)))).
    ref = jnp.matmul(W[None], jnp.matmul(X, jnp.swapaxes(W, -1, -2)[None]))
    assert out.shape == (batch, n_freq, d, d)
    assert jnp.allclose(out, ref, rtol=1e-4, atol=1e-3), "mismatch vs reference"

    print("KERNEL_OK")
</pallas_src>

<mosaic_0001>
module attributes {stable_mosaic.version = 11 : i64} {
  func.func @_translation_kernel(%arg0: i32, %arg1: i32, %arg2: memref<1x256x256xf32, #tpu.memory_space<vmem>>, %arg3: memref<64x256xf32, #tpu.memory_space<vmem>>, %arg4: memref<64x256xf32, #tpu.memory_space<vmem>>) attributes {dimension_semantics = [#tpu.dimension_semantics<parallel>, #tpu.dimension_semantics<parallel>], iteration_bounds = array<i64: 8, 1>, scalar_prefetch = 0 : i64, scratch_operands = 0 : i64, tpu.core_type = #tpu.core_type<tc>, window_params = [{transform_indices = @transform_0, window_bounds = array<i64: 1, 256, 256>}, {transform_indices = @transform_1, window_bounds = array<i64: 64, 256>}, {transform_indices = @transform_2, window_bounds = array<i64: 64, 256>}]} {
    %c0 = arith.constant 0 : index
    %c0_0 = arith.constant 0 : index
    %0 = vector.load %arg3[%c0, %c0_0] : memref<64x256xf32, #tpu.memory_space<vmem>>, vector<64x256xf32>
    %c0_1 = arith.constant 0 : index
    %c0_2 = arith.constant 0 : index
    %c0_3 = arith.constant 0 : index
    %1 = vector.load %arg2[%c0_1, %c0_2, %c0_3] : memref<1x256x256xf32, #tpu.memory_space<vmem>>, vector<1x256x256xf32>
    %2 = vector.shape_cast %1 : vector<1x256x256xf32> to vector<256x256xf32>
    %cst = arith.constant dense<0.000000e+00> : vector<64x256xf32>
    %3 = tpu.matmul %0, %2, %cst {dimension_numbers = #tpu.dot_dimension_numbers<[1], [1], [0], [0], [0, 0, 1, 0], [], []>} : vector<64x256xf32>, vector<256x256xf32>, vector<64x256xf32> -> vector<64x256xf32>
    %c0_4 = arith.constant 0 : index
    %c0_5 = arith.constant 0 : index
    %4 = vector.load %arg4[%c0_4, %c0_5] : memref<64x256xf32, #tpu.memory_space<vmem>>, vector<64x256xf32>
    tpu.vector_store %arg4[%c0_4, %c0_5], %3 {strides = array<i32>} : memref<64x256xf32, #tpu.memory_space<vmem>>, vector<64x256xf32>,
    return
  }
  func.func @transform_0(%arg0: i32, %arg1: i32) -> (i32, i32, i32) {
    %c0_i32 = arith.constant 0 : i32
    %c0_i32_0 = arith.constant 0 : i32
    %c0_i32_1 = arith.constant 0 : i32
    return %arg0, %c0_i32, %c0_i32_0 : i32, i32, i32
  }
  func.func @transform_1(%arg0: i32, %arg1: i32) -> (i32, i32) {
    %c0_i32 = arith.constant 0 : i32
    return %arg1, %arg0 : i32, i32
  }
  func.func @transform_2(%arg0: i32, %arg1: i32) -> (i32, i32) {
    %c0_i32 = arith.constant 0 : i32
    return %arg1, %arg0 : i32, i32
  }
}

</mosaic_0001>

<bundles_post_ra>
// kernel: tpu_custom_call.1
= control target key start
LH: loop header
LB: loop body
LE: loop exit
PB: predicated region body
PF: predicated region fallthrough
CT: control target
= control target key end

     0   :  { %7 = vsyncpa [#allocation3], 0  ;;  %s1131_s0 = inlined_call_operand.hbm [shape: f32[8,256,256], index: 0, kind: input, shape index: {}]   ;;  %s1132_s1 = inlined_call_operand.hbm [shape: f32[64,2048], index: 1, kind: input, shape index: {}]   ;;  %s1133_s2 = inlined_call_operand.hbm [shape: f32[64,2048], index: 2, kind: output, shape index: {}]  }
   0x1   :  { %9 = vsyncpa [#allocation3 + $0x1], 0 }
   0x2   :  { %10 = vsyncpa [#allocation6], 0 }
   0x3   :  { %12 = vsyncpa [#allocation6 + $0x1], 0 }
   0x4   :  { %13 = vsyncpa [#allocation4], 0 }
   0x5   :  { %15 = vsyncpa [#allocation4 + $0x1], 0  ;;  %s882_s9 = smov 0   ;;  %s884_s10 = smov 0  }
   0x6   :  { %s886_s11 = smov 0   ;;  %s888_s12 = smov 0  }
   0x7   :  { %s890_s13 = smov 0   ;;  %s892_s14 = smov 0  }
   0x8 LB: > { %s618_s15 = sadd.s32 4294967295, %s859_s14   ;;  %s619_s16 = sadd.s32 4294967294, %s859_s14   ;;  %s859_s14 = sphi %s892_s14, %s21_s14   ;;  %s855_s13 = sphi %s890_s13, %s1143_s13   ;;  %s851_s12 = sphi %s888_s12, %s1142_s12   ;;  %s847_s11 = sphi %s886_s11, %s1141_s11   ;;  %s843_s10 = sphi %s884_s10, %s1140_s10   ;;  %s839_s9 = sphi %s882_s9, %s1139_s9  }
   0x9   : > { %s33_s17 = sadd.s32 1, %s855_s13  ;;  %s40_s18 = sadd.s32 1, %s847_s11 }
   0xa   : > { %p35_p0 = scmp.ge.s32.totalorder %s33_s17, 8  ;;  %p47_p1 = scmp.ne.s32.totalorder %s847_s11, %s843_s10 }
   0xb   : > { %p48_p2 = scmp.eq.s32.totalorder %s859_s14, 0  ;;  %p53_p3 = scmp.ne.s32.totalorder %s843_s10, %s839_s9 }
   0xc   : > { %s1145_s17 = smov (%p35_p0, %s33_s17), 0  ;;  %p54_p5 = scmp.eq.s32.totalorder %s618_s15, 0 }
   0xd   : > { %p923_p4 = por %p48_p2, %p47_p1  ;;  %s37_s20 = ssub.s32 %s855_s13, %s1145_s17 }
   0xe   : > { %p107_p6 = scmp.eq.s32.totalorder %s618_s15, 7  ;;  %p38_p7 = scmp.eq.s32.totalorder %s37_s20, 0 }
   0xf   : > { %p929_p8 = por %p54_p5, %p53_p3  ;;  %p113_p10 = scmp.eq.s32.totalorder %s619_s16, 7 }
  0x10   : > { %p933_p9 = por %p107_p6, %p47_p1  ;;  %p657_p12 = scmp.lt.s32.totalorder %s859_s14, 8 }
  0x11   : > { %s938_s23 = scalar_select %p38_p7, %s847_s11, %s40_s18  }
  0x12   : > { %p940_p11 = por %p113_p10, %p53_p3  ;;  %s946_s25 = sand.u32 1, %s847_s11  }
  0x13   : > { %s622_s26 = sshll.u32 %s946_s25, 9  ;;  %s637_s27 = sshll.u32 %s855_s13, 9 }
  0x14   : > { %s142_s30 = scalar_lea.hbm %s1131_s0, %s637_s27  ;;  %s137_s3 = scalar_lea.vmem [#allocation2], %s622_s26 }
  0x15   : > { %s145_s4 = sshll.u32 %s137_s3, 4  ;;  %s143_s5 = sshll.u32 %s142_s30, 4  ;;  %s146_s4 = int_to_ptr.vmem [resolvable:$true] %s145_s4  ;;  %s144_s5 = int_to_ptr.hbm [resolvable:$true] %s143_s5 }
  0x16   : > { %p955_p13 = pnand %p657_p12, %p923_p4  ;;  %p628_p0 = scmp.ge.s32.totalorder %s859_s14, 1 }
  0x17   : > { %s134_s7 = scalar_lea.sflag [#allocation3], %s946_s25  ;;  %s861_s8 = smov 256  }
  0x18   : > { %s862_s15 = smov 16   ;;  %p178_p1 = scmp.lt.s32.totalorder %s859_s14, 9 }
  0x19   : > { %649 = dma.hbm_to_vmem [thread:$0]  (!%p955_p13), %s144_s5, 8192, %s146_s4, %s134_s7, %s861_s8, %s861_s8, %s862_s15  }
  0x1a   : > { %s625_s16 = sshll.u32 %s946_s25, 7  ;;  %s638_s18 = sshll.u32 %s855_s13, 4 }
  0x1b   : > { %p179_p2 = pnand %p628_p0, %p178_p1  ;;  %s167_s19 = scalar_lea.hbm %s1132_s1, %s638_s18 }
  0x1c   : > { %s159_s27 = scalar_lea.vmem [#allocation5], %s625_s16  ;;  %s168_s29 = sshll.u32 %s167_s19, 4  ;;  %s169_s29 = int_to_ptr.hbm [resolvable:$true] %s168_s29 }
  0x1d   : > { %s170_s28 = sshll.u32 %s159_s27, 4  ;;  %s156_s30 = scalar_lea.sflag [#allocation6], %s946_s25  ;;  %s171_s28 = int_to_ptr.vmem [resolvable:$true] %s170_s28 }
  0x1e   : > { %s863_s3 = smov 2048   ;;  %182 = sbr.rel (%p179_p2) target bundleno = 298 (0x12a), region = 28 }
  0x1f   : > { %652 = dma.hbm_to_vmem [thread:$0]  (!%p955_p13), %s169_s29, 2048, %s171_s28, %s156_s30, %s863_s3, %s861_s8, %s862_s15  }
  0x20   : > { %s973_s4 = sand.u32 (!%p179_p2), 1, %s843_s10  }
  0x21   : > { %s629_s5 = sshll.u32 (!%p179_p2), %s973_s4, 9  ;;  %s185_s7 = scalar_lea.sflag (!%p179_p2), [#allocation3], %s973_s4 }
  0x22   : > { %s977_s20 = scalar_lea.vmem (!%p179_p2), [#allocation2], %s629_s5 }
  0x23   : > { %826 = dma.done.wait (%p929_p8), %s185_s7, 8192  }
  0x24   : > { %828 = vsyncadd (%p929_p8), %s185_s7, 4294959104  ;;  %s630_s25 = sshll.u32 %s973_s4, 7  ;;  %s195_s6 = scalar_lea.sflag [#allocation6], %s973_s4 }
  0x25   : > { %s987_s8 = scalar_lea.vmem [#allocation5], %s630_s25 }
  0x26   : > { %830 = dma.done.wait (%p929_p8), %s195_s6, 2048  }
  0x27   : > { %832 = vsyncadd (%p929_p8), %s195_s6, 4294965248  ;;  %v307_v0 = vld [vmem:[%s977_s20 + $0x1f0] sm:$0xff]  ;;  %v308_v1 = vld [vmem:[%s977_s20 + $0x1f8] sm:$0xff]  ;;  %s1075_s21 = scalar_lea.vmem [#allocation7], %s630_s25  ;;  %s639_s15 = sshll.u32 %s851_s12, 4 }
  0x28   : > { %391 = vmatpush.xpose.msra.mxu2 %v307_v0  ;;  %432 = vmatpush.xpose.msra.mxu3 %v308_v1  ;;  %v275_v2 = vld [vmem:[%s977_s20 + $0xf0] sm:$0xff]  ;;  %v276_v3 = vld [vmem:[%s977_s20 + $0xf8] sm:$0xff]  ;;  %v305_v4 = vld [vmem:[%s977_s20 + $0x1e0] sm:$0xff]  ;;  %s504_s26 = scalar_lea.hbm %s1133_s2, %s639_s15  ;;  %s505_s19 = sshll.u32 %s1075_s21, 4  ;;  %s506_s19 = int_to_ptr.vmem [resolvable:$true] %s505_s19 }
  0x29   : > { %v306_v5 = vld [vmem:[%s977_s20 + $0x1e8] sm:$0xff]  ;;  %309 = vmatpush.xpose.msra.mxu0 %v275_v2  ;;  %350 = vmatpush.xpose.msra.mxu1 %v276_v3  ;;  %v273_v6 = vld [vmem:[%s977_s20 + $0xe0] sm:$0xff]  ;;  %v303_v8 = vld [vmem:[%s977_s20 + $0x1d0] sm:$0xff]  ;;  %s507_s27 = sshll.u32 %s504_s26, 4  ;;  %s490_s12 = scalar_lea.sflag [#allocation4], %s973_s4  ;;  %s508_s27 = int_to_ptr.hbm [resolvable:$true] %s507_s27 }
  0x2a   : > { %v274_v7 = vld [vmem:[%s977_s20 + $0xe8] sm:$0xff]  ;;  %v304_v9 = vld [vmem:[%s977_s20 + $0x1d8] sm:$0xff]  ;;  %v271_v10 = vld [vmem:[%s977_s20 + $0xd0] sm:$0xff]  ;;  %s787_s28 = sshra.s32 %s508_s27, 4  ;;  %s793_s5 = scalar_lea.hbm %s1133_s2, 1024  ;;  %s788_s28 = int_to_ptr.hbm [resolvable:$true] %s787_s28 }
  0x2b   : > { %v272_v11 = vld [vmem:[%s977_s20 + $0xd8] sm:$0xff]  ;;  %v301_v12 = vld [vmem:[%s977_s20 + $0x1c0] sm:$0xff]  ;;  %v302_v13 = vld [vmem:[%s977_s20 + $0x1c8] sm:$0xff]  ;;  %s789_s29 = scalar_lea.hbm %s788_s28, 128  ;;  %p794_p6 = scmp.lt.s32.totalorder %s788_s28, %s1133_s2 }
  0x2c   : > { %392 = vmatpush.xpose.msra.mxu2 %v305_v4  ;;  %433 = vmatpush.xpose.msra.mxu3 %v306_v5  ;;  %v269_v14 = vld [vmem:[%s977_s20 + $0xc0] sm:$0xff]  ;;  %v270_v15 = vld [vmem:[%s977_s20 + $0xc8] sm:$0xff]  ;;  %v299_v16 = vld [vmem:[%s977_s20 + $0x1b0] sm:$0xff]  ;;  %p790_p3 = scmp.ne.s32.totalorder %s788_s28, %s789_s29  ;;  %p795_p7 = scmp.lt.s32.totalorder %s793_s5, %s789_s29 }
  0x2d   : > { %310 = vmatpush.xpose.msra.mxu0 %v273_v6  ;;  %351 = vmatpush.xpose.msra.mxu1 %v274_v7  ;;  %v300_v17 = vld [vmem:[%s977_s20 + $0x1b8] sm:$0xff]  ;;  %v267_v18 = vld [vmem:[%s977_s20 + $0xb0] sm:$0xff]  ;;  %v297_v20 = vld [vmem:[%s977_s20 + $0x1a0] sm:$0xff] }
  0x2e   : > { %v268_v19 = vld [vmem:[%s977_s20 + $0xb8] sm:$0xff]  ;;  %v298_v21 = vld [vmem:[%s977_s20 + $0x1a8] sm:$0xff]  ;;  %v265_v22 = vld [vmem:[%s977_s20 + $0xa0] sm:$0xff]  ;;  %p791_p4 = pnand %p790_p3, %p933_p9  ;;  %p796_p8 = por %p795_p7, %p794_p6 }
  0x2f   : > { %v266_v23 = vld [vmem:[%s977_s20 + $0xa8] sm:$0xff]  ;;  %v295_v24 = vld [vmem:[%s977_s20 + $0x190] sm:$0xff]  ;;  %v296_v25 = vld [vmem:[%s977_s20 + $0x198] sm:$0xff] }
  0x30   : > { %393 = vmatpush.xpose.msra.mxu2 %v303_v8  ;;  %434 = vmatpush.xpose.msra.mxu3 %v304_v9  ;;  %v263_v26 = vld [vmem:[%s977_s20 + $0x90] sm:$0xff]  ;;  %v264_v27 = vld [vmem:[%s977_s20 + $0x98] sm:$0xff]  ;;  %v293_v28 = vld [vmem:[%s977_s20 + $0x180] sm:$0xff]  ;;  %p792_p5 = pneg %p791_p4 }
  0x31   : > { %311 = vmatpush.xpose.msra.mxu0 %v271_v10  ;;  %352 = vmatpush.xpose.msra.mxu1 %v272_v11  ;;  %v294_v29 = vld [vmem:[%s977_s20 + $0x188] sm:$0xff]  ;;  %v261_v30 = vld [vmem:[%s977_s20 + $0x80] sm:$0xff]  ;;  %v291_v32 = vld [vmem:[%s977_s20 + $0x170] sm:$0xff] }
  0x32   : > { %v262_v31 = vld [vmem:[%s977_s20 + $0x88] sm:$0xff]  ;;  %v292_v33 = vld [vmem:[%s977_s20 + $0x178] sm:$0xff]  ;;  %v259_v34 = vld [vmem:[%s977_s20 + $0x70] sm:$0xff]  ;;  %p797_p10 = pnand %p796_p8, %p792_p5 }
  0x33   : > { %v260_v35 = vld [vmem:[%s977_s20 + $0x78] sm:$0xff]  ;;  %v289_v36 = vld [vmem:[%s977_s20 + $0x160] sm:$0xff]  ;;  %v290_v37 = vld [vmem:[%s977_s20 + $0x168] sm:$0xff] }
  0x34   : > { %394 = vmatpush.xpose.msra.mxu2 %v301_v12  ;;  %435 = vmatpush.xpose.msra.mxu3 %v302_v13  ;;  %v257_v38 = vld [vmem:[%s977_s20 + $0x60] sm:$0xff]  ;;  %v258_v39 = vld [vmem:[%s977_s20 + $0x68] sm:$0xff]  ;;  %v287_v40 = vld [vmem:[%s977_s20 + $0x150] sm:$0xff] }
  0x35   : > { %312 = vmatpush.xpose.msra.mxu0 %v269_v14  ;;  %353 = vmatpush.xpose.msra.mxu1 %v270_v15  ;;  %v288_v41 = vld [vmem:[%s977_s20 + $0x158] sm:$0xff]  ;;  %v255_v42 = vld [vmem:[%s977_s20 + $0x50] sm:$0xff]  ;;  %v285_v44 = vld [vmem:[%s977_s20 + $0x140] sm:$0xff] }
  0x36   : > { %v256_v43 = vld [vmem:[%s977_s20 + $0x58] sm:$0xff]  ;;  %v286_v45 = vld [vmem:[%s977_s20 + $0x148] sm:$0xff]  ;;  %v253_v46 = vld [vmem:[%s977_s20 + $0x40] sm:$0xff] }
  0x37   : > { %v254_v47 = vld [vmem:[%s977_s20 + $0x48] sm:$0xff]  ;;  %v283_v48 = vld [vmem:[%s977_s20 + $0x130] sm:$0xff]  ;;  %v284_v49 = vld [vmem:[%s977_s20 + $0x138] sm:$0xff] }
  0x38   : > { %395 = vmatpush.xpose.msra.mxu2 %v299_v16  ;;  %436 = vmatpush.xpose.msra.mxu3 %v300_v17  ;;  %v251_v50 = vld [vmem:[%s977_s20 + $0x30] sm:$0xff]  ;;  %v252_v51 = vld [vmem:[%s977_s20 + $0x38] sm:$0xff]  ;;  %v281_v52 = vld [vmem:[%s977_s20 + $0x120] sm:$0xff] }
  0x39   : > { %313 = vmatpush.xpose.msra.mxu0 %v267_v18  ;;  %354 = vmatpush.xpose.msra.mxu1 %v268_v19  ;;  %v282_v53 = vld [vmem:[%s977_s20 + $0x128] sm:$0xff]  ;;  %v249_v54 = vld [vmem:[%s977_s20 + $0x20] sm:$0xff]  ;;  %v279_v56 = vld [vmem:[%s977_s20 + $0x110] sm:$0xff] }
  0x3a   : > { %v250_v55 = vld [vmem:[%s977_s20 + $0x28] sm:$0xff]  ;;  %v280_v57 = vld [vmem:[%s977_s20 + $0x118] sm:$0xff]  ;;  %v247_v58 = vld [vmem:[%s977_s20 + $0x10] sm:$0xff] }
  0x3b   : > { %v248_v59 = vld [vmem:[%s977_s20 + $0x18] sm:$0xff]  ;;  %v277_v60 = vld [vmem:[%s977_s20 + $0x100] sm:$0xff]  ;;  %v278_v61 = vld [vmem:[%s977_s20 + $0x108] sm:$0xff] }
  0x3c   : > { %396 = vmatpush.xpose.msra.mxu2 %v297_v20  ;;  %437 = vmatpush.xpose.msra.mxu3 %v298_v21  ;;  %v245_v62 = vld [vmem:[%s977_s20] sm:$0xff]  ;;  %v246_v63 = vld [vmem:[%s977_s20 + $0x8] sm:$0xff]  ;;  %v231_v2 = vld [vmem:[%s987_s8 + $0x10] sm:$0xff] }
  0x3d   : > { %314 = vmatpush.xpose.msra.mxu0 %v265_v22  ;;  %355 = vmatpush.xpose.msra.mxu1 %v266_v23  ;;  %v229_v0 = vld [vmem:[%s987_s8] sm:$0xff]  ;;  %v230_v1 = vld [vmem:[%s987_s8 + $0x8] sm:$0xff]  ;;  %v232_v3 = vld [vmem:[%s987_s8 + $0x18] sm:$0xff] }
  0x3e   : > { %v233_v4 = vld [vmem:[%s987_s8 + $0x20] sm:$0xff]  ;;  %v234_v5 = vld [vmem:[%s987_s8 + $0x28] sm:$0xff]  ;;  %v235_v6 = vld [vmem:[%s987_s8 + $0x30] sm:$0xff] }
  0x3f   : > { %v236_v7 = vld [vmem:[%s987_s8 + $0x38] sm:$0xff]  ;;  %v237_v8 = vld [vmem:[%s987_s8 + $0x40] sm:$0xff]  ;;  %v238_v9 = vld [vmem:[%s987_s8 + $0x48] sm:$0xff] }
  0x40   : > { %397 = vmatpush.xpose.msra.mxu2 %v295_v24  ;;  %438 = vmatpush.xpose.msra.mxu3 %v296_v25  ;;  %v239_v10 = vld [vmem:[%s987_s8 + $0x50] sm:$0xff]  ;;  %v240_v11 = vld [vmem:[%s987_s8 + $0x58] sm:$0xff]  ;;  %v241_v12 = vld [vmem:[%s987_s8 + $0x60] sm:$0xff] }
  0x41   : > { %315 = vmatpush.xpose.msra.mxu0 %v263_v26  ;;  %356 = vmatpush.xpose.msra.mxu1 %v264_v27  ;;  %v242_v13 = vld [vmem:[%s987_s8 + $0x68] sm:$0xff]  ;;  %v243_v14 = vld [vmem:[%s987_s8 + $0x70] sm:$0xff]  ;;  %v244_v15 = vld [vmem:[%s987_s8 + $0x78] sm:$0xff] }
  0x44   : > { %398 = vmatpush.xpose.msra.mxu2 %v293_v28  ;;  %439 = vmatpush.xpose.msra.mxu3 %v294_v29 }
  0x45   : > { %316 = vmatpush.xpose.msra.mxu0 %v261_v30  ;;  %357 = vmatpush.xpose.msra.mxu1 %v262_v31 }
  0x48   : > { %399 = vmatpush.xpose.msra.mxu2 %v291_v32  ;;  %440 = vmatpush.xpose.msra.mxu3 %v292_v33 }
  0x49   : > { %317 = vmatpush.xpose.msra.mxu0 %v259_v34  ;;  %358 = vmatpush.xpose.msra.mxu1 %v260_v35 }
  0x4c   : > { %400 = vmatpush.xpose.msra.mxu2 %v289_v36  ;;  %441 = vmatpush.xpose.msra.mxu3 %v290_v37 }
  0x4d   : > { %318 = vmatpush.xpose.msra.mxu0 %v257_v38  ;;  %359 = vmatpush.xpose.msra.mxu1 %v258_v39 }
  0x50   : > { %401 = vmatpush.xpose.msra.mxu2 %v287_v40  ;;  %442 = vmatpush.xpose.msra.mxu3 %v288_v41 }
  0x51   : > { %319 = vmatpush.xpose.msra.mxu0 %v255_v42  ;;  %360 = vmatpush.xpose.msra.mxu1 %v256_v43 }
  0x54   : > { %402 = vmatpush.xpose.msra.mxu2 %v285_v44  ;;  %443 = vmatpush.xpose.msra.mxu3 %v286_v45 }
  0x55   : > { %320 = vmatpush.xpose.msra.mxu0 %v253_v46  ;;  %361 = vmatpush.xpose.msra.mxu1 %v254_v47 }
  0x58   : > { %403 = vmatpush.xpose.msra.mxu2 %v283_v48  ;;  %444 = vmatpush.xpose.msra.mxu3 %v284_v49 }
  0x59   : > { %321 = vmatpush.xpose.msra.mxu0 %v251_v50  ;;  %362 = vmatpush.xpose.msra.mxu1 %v252_v51 }
  0x5c   : > { %404 = vmatpush.xpose.msra.mxu2 %v281_v52  ;;  %445 = vmatpush.xpose.msra.mxu3 %v282_v53 }
  0x5d   : > { %322 = vmatpush.xpose.msra.mxu0 %v249_v54  ;;  %363 = vmatpush.xpose.msra.mxu1 %v250_v55 }
  0x60   : > { %405 = vmatpush.xpose.msra.mxu2 %v279_v56  ;;  %446 = vmatpush.xpose.msra.mxu3 %v280_v57 }
  0x61   : > { %323 = vmatpush.xpose.msra.mxu0 %v247_v58  ;;  %364 = vmatpush.xpose.msra.mxu1 %v248_v59 }
  0x64   : > { %406 = vmatpush.xpose.msra.mxu2 %v277_v60  ;;  %447 = vmatpush.xpose.msra.mxu3 %v278_v61 }
  0x65   : > { %324 = vmatpush.xpose.msra.mxu0 %v245_v62  ;;  %365 = vmatpush.xpose.msra.mxu1 %v246_v63 }
  0x67   : > { %407 = vmatmul.f32.vlgmr.msra.gmra.mxu2 %v229_v0  ;;  %448 = vmatmul.f32.vlgmr.msra.gmra.mxu3 %v230_v1 }
  0x68   : > { %325 = vmatmul.f32.vlgmr.msra.gmra.mxu0 %v229_v0  ;;  %366 = vmatmul.f32.vlgmr.msra.gmra.mxu1 %v230_v1 }
  0x6f   : > { %410 = vmatmul.f32.gmra.mxu2 %v231_v2  ;;  %451 = vmatmul.f32.gmra.mxu3 %v232_v3 }
  0x70   : > { %328 = vmatmul.f32.gmra.mxu0 %v231_v2  ;;  %369 = vmatmul.f32.gmra.mxu1 %v232_v3 }
  0x77   : > { %413 = vmatmul.f32.gmra.mxu2 %v233_v4  ;;  %454 = vmatmul.f32.gmra.mxu3 %v234_v5 }
  0x78   : > { %331 = vmatmul.f32.gmra.mxu0 %v233_v4  ;;  %372 = vmatmul.f32.gmra.mxu1 %v234_v5 }
  0x7f   : > { %416 = vmatmul.f32.gmra.mxu2 %v235_v6  ;;  %457 = vmatmul.f32.gmra.mxu3 %v236_v7 }
  0x80   : > { %334 = vmatmul.f32.gmra.mxu0 %v235_v6  ;;  %375 = vmatmul.f32.gmra.mxu1 %v236_v7 }
  0x87   : > { %419 = vmatmul.f32.gmra.mxu2 %v237_v8  ;;  %460 = vmatmul.f32.gmra.mxu3 %v238_v9 }
  0x88   : > { %337 = vmatmul.f32.gmra.mxu0 %v237_v8  ;;  %378 = vmatmul.f32.gmra.mxu1 %v238_v9 }
  0x8f   : > { %422 = vmatmul.f32.gmra.mxu2 %v239_v10  ;;  %463 = vmatmul.f32.gmra.mxu3 %v240_v11 }
  0x90   : > { %340 = vmatmul.f32.gmra.mxu0 %v239_v10  ;;  %381 = vmatmul.f32.gmra.mxu1 %v240_v11 }
  0x97   : > { %425 = vmatmul.f32.gmra.mxu2 %v241_v12  ;;  %466 = vmatmul.f32.gmra.mxu3 %v242_v13 }
  0x98   : > { %343 = vmatmul.f32.gmra.mxu0 %v241_v12  ;;  %384 = vmatmul.f32.gmra.mxu1 %v242_v13 }
  0x9f   : > { %428 = vmatmul.f32.gmra.mxu2 %v243_v14  ;;  %469 = vmatmul.f32.gmra.mxu3 %v244_v15 }
  0xa0   : > { %346 = vmatmul.f32.gmra.mxu0 %v243_v14  ;;  %387 = vmatmul.f32.gmra.mxu1 %v244_v15 }
  0xe5   : > { %v326_v16 = vpop.f32.mrf.mxu0  ;;  %v367_v17 = vpop.f32.mrf.mxu1 }
  0xe6   : > { %v368_v18 = vadd.f32 %v367_v17, %v326_v16 }
  0xe8   : > { %473 = vst [vmem:[%s1075_s21] sm:$0xff] %v368_v18 }
  0xea   : > { %v408_v19 = vpop.f32.mrf.mxu2  ;;  %v449_v20 = vpop.f32.mrf.mxu3 }
  0xeb   : > { %v450_v21 = vadd.f32 %v449_v20, %v408_v19 }
  0xed   : > { %474 = vst [vmem:[%s1075_s21 + $0x8] sm:$0xff] %v450_v21  ;;  %v329_v22 = vpop.f32.mrf.mxu0  ;;  %v370_v23 = vpop.f32.mrf.mxu1 }
  0xee   : > { %v371_v24 = vadd.f32 %v370_v23, %v329_v22 }
  0xf0   : > { %475 = vst [vmem:[%s1075_s21 + $0x10] sm:$0xff] %v371_v24 }
  0xf2   : > { %v411_v25 = vpop.f32.mrf.mxu2  ;;  %v452_v26 = vpop.f32.mrf.mxu3 }
  0xf3   : > { %v453_v27 = vadd.f32 %v452_v26, %v411_v25 }
  0xf5   : > { %476 = vst [vmem:[%s1075_s21 + $0x18] sm:$0xff] %v453_v27  ;;  %v332_v28 = vpop.f32.mrf.mxu0  ;;  %v373_v29 = vpop.f32.mrf.mxu1 }
  0xf6   : > { %v374_v30 = vadd.f32 %v373_v29, %v332_v28 }
  0xf8   : > { %477 = vst [vmem:[%s1075_s21 + $0x20] sm:$0xff] %v374_v30 }
  0xfa   : > { %v414_v31 = vpop.f32.mrf.mxu2  ;;  %v455_v32 = vpop.f32.mrf.mxu3 }
  0xfb   : > { %v456_v33 = vadd.f32 %v455_v32, %v414_v31 }
  0xfd   : > { %478 = vst [vmem:[%s1075_s21 + $0x28] sm:$0xff] %v456_v33  ;;  %v335_v34 = vpop.f32.mrf.mxu0  ;;  %v376_v35 = vpop.f32.mrf.mxu1 }
  0xfe   : > { %v377_v36 = vadd.f32 %v376_v35, %v335_v34 }
 0x100   : > { %479 = vst [vmem:[%s1075_s21 + $0x30] sm:$0xff] %v377_v36 }
 0x102   : > { %v417_v37 = vpop.f32.mrf.mxu2  ;;  %v458_v38 = vpop.f32.mrf.mxu3 }
 0x103   : > { %v459_v39 = vadd.f32 %v458_v38, %v417_v37 }
 0x105   : > { %480 = vst [vmem:[%s1075_s21 + $0x38] sm:$0xff] %v459_v39  ;;  %v338_v40 = vpop.f32.mrf.mxu0  ;;  %v379_v41 = vpop.f32.mrf.mxu1 }
 0x106   : > { %v380_v42 = vadd.f32 %v379_v41, %v338_v40 }
 0x108   : > { %481 = vst [vmem:[%s1075_s21 + $0x40] sm:$0xff] %v380_v42 }
 0x10a   : > { %v420_v43 = vpop.f32.mrf.mxu2  ;;  %v461_v44 = vpop.f32.mrf.mxu3 }
 0x10b   : > { %v462_v45 = vadd.f32 %v461_v44, %v420_v43 }
 0x10d   : > { %482 = vst [vmem:[%s1075_s21 + $0x48] sm:$0xff] %v462_v45  ;;  %v341_v46 = vpop.f32.mrf.mxu0  ;;  %v382_v47 = vpop.f32.mrf.mxu1 }
 0x10e   : > { %v383_v48 = vadd.f32 %v382_v47, %v341_v46 }
 0x110   : > { %483 = vst [vmem:[%s1075_s21 + $0x50] sm:$0xff] %v383_v48 }
 0x112   : > { %v423_v49 = vpop.f32.mrf.mxu2  ;;  %v464_v50 = vpop.f32.mrf.mxu3 }
 0x113   : > { %v465_v51 = vadd.f32 %v464_v50, %v423_v49 }
 0x115   : > { %484 = vst [vmem:[%s1075_s21 + $0x58] sm:$0xff] %v465_v51  ;;  %v344_v52 = vpop.f32.mrf.mxu0  ;;  %v385_v53 = vpop.f32.mrf.mxu1 }
 0x116   : > { %v386_v54 = vadd.f32 %v385_v53, %v344_v52 }
 0x118   : > { %485 = vst [vmem:[%s1075_s21 + $0x60] sm:$0xff] %v386_v54 }
 0x11a   : > { %v426_v55 = vpop.f32.mrf.mxu2  ;;  %v467_v56 = vpop.f32.mrf.mxu3 }
 0x11b   : > { %v468_v57 = vadd.f32 %v467_v56, %v426_v55 }
 0x11d   : > { %486 = vst [vmem:[%s1075_s21 + $0x68] sm:$0xff] %v468_v57  ;;  %v347_v58 = vpop.f32.mrf.mxu0  ;;  %v388_v59 = vpop.f32.mrf.mxu1 }
 0x11e   : > { %v389_v60 = vadd.f32 %v388_v59, %v347_v58 }
 0x120   : > { %487 = vst [vmem:[%s1075_s21 + $0x70] sm:$0xff] %v389_v60 }
 0x122   : > { %v429_v61 = vpop.f32.mrf.mxu2  ;;  %v470_v62 = vpop.f32.mrf.mxu3 }
 0x123   : > { %v471_v63 = vadd.f32 %v470_v62, %v429_v61 }
 0x125   : > { %488 = vst [vmem:[%s1075_s21 + $0x78] sm:$0xff] %v471_v63 }
 0x126   : > { %800 = shalt.err (!%p797_p10)
}
 0x127   : > { %s864_s4 = smov 256   ;;  %s865_s25 = smov 2048  }
 0x128   : > { %s866_s6 = smov 16  }
 0x129   : > { %644 = dma.vmem_to_hbm [thread:$0]  (%p933_p9), %s506_s19, 2048, %s508_s27, %s490_s12, %s864_s4, %s865_s25, %s866_s6  }
 0x12a PF: > { %p658_p12 = scmp.ge.s32.totalorder %s859_s14, 2  ;;  %s522_s8 = sand.u32 1, %s839_s9  }
 0x12b   : > { %s523_s21 = scalar_lea.sflag [#allocation4], %s522_s8 }
 0x12c   : > { %p654_p13 = pnand %p658_p12, %p940_p11 }
 0x12e   : > { %p655_p0 = pneg %p654_p13 }
 0x130   : > { %834 = dma.done.wait (%p655_p0), %s523_s21, 2048  }
 0x131   : > { %836 = vsyncadd (%p655_p0), %s523_s21, 4294965248  ;;  %s21_s14 = sadd.s32 1, %s859_s14   ;;  %s1139_s9 = smov %s843_s10 }
 0x132   : > { %p18_p1 = scmp.ge.s32.totalorder %s21_s14, 10   ;;  %s1140_s10 = smov %s847_s11 }
 0x133   : > { %s1141_s11 = smov %s938_s23  ;;  %s1142_s12 = smov %s855_s13 }
 0x134   : > { %s1143_s13 = smov %s1145_s17  ;;  %20 = sbr.rel (!%p18_p1) target bundleno = 8 (0x8), region = 86 }
 0x139   :  { %529 = vsyncpa [#allocation3], 1 }
 0x13a   :  { %531 = vsyncpa [#allocation3 + $0x1], 1 }
 0x13b   :  { %532 = vsyncpa [#allocation6], 1 }
 0x13c   :  { %534 = vsyncpa [#allocation6 + $0x1], 1 }
 0x13d   :  { %535 = vsyncpa [#allocation4], 1 }
 0x13e   :  { %537 = vsyncpa [#allocation4 + $0x1], 1 }

</bundles_post_ra>
